<compile_context>
chip_gen: v7x
topology: tpu7x:2x2x1
jax: 0.10.0
libtpu: 0.0.40
codegen_flags: <defaults>
</compile_context>

<pallas_src>
import functools

import jax
import jax.numpy as jnp
from jax.experimental import pallas as pl
from jax.experimental.pallas import tpu as pltpu


# ---------------------------------------------------------------------------
# Fused kernel: whole MLP forward for one batch tile.
#   kernel args = (x_ref, w0_ref, ..., w_{L-1}_ref, b_packed_ref, o_ref)
# Intermediate activations never leave vregs/VMEM.
# ---------------------------------------------------------------------------
def _fused_mlp_kernel(x_ref, *refs, mxu_dtype):
    o_ref = refs[-1]
    b_ref = refs[-2]                          # (L, max_d_out) packed biases, f32
    w_refs = refs[:-2]
    num_layers = len(w_refs)

    b_all = b_ref[...]                        # load once; tiny
    h = x_ref[...].astype(jnp.float32)        # (TB, D_in), f32 working dtype
    for layer in range(num_layers):
        w = w_refs[layer][...]                # (d_in_l, d_out_l), mxu_dtype
        d_out = w.shape[1]
        # MXU: mxu_dtype operands, f32 accumulation.
        h = jnp.dot(h.astype(mxu_dtype), w.astype(mxu_dtype),
                    preferred_element_type=jnp.float32)
        h = h + b_all[layer, :d_out]          # f32 bias add (broadcast over batch)
        if layer < num_layers - 1:            # hidden layers get ReLU (f32)
            h = jnp.maximum(h, 0.0)
    o_ref[...] = h.astype(o_ref.dtype)


# ---------------------------------------------------------------------------
# Wrapper: one pallas_call for the whole network.
# ---------------------------------------------------------------------------
def linear_qnet_forward(params, x, *, batch_tile: int = 1024,
                        mxu_dtype=jnp.bfloat16):
    """Fused forward: h = relu(h @ W + b) per hidden layer; out = h @ Wo + bo."""
    B, D_in = x.shape
    num_layers = len(params)
    layer_dims = [(int(w.shape[0]), int(w.shape[1])) for w, _ in params]
    D_out = layer_dims[-1][1]
    max_d_out = max(d for _, d in layer_dims)
    assert layer_dims[0][0] == D_in

    # --- batch tiling (no padding / slicing: Pallas masks the ragged block) --
    if B <= batch_tile:
        TB = B                                # single full block (always legal)
    else:
        TB = max(8, (batch_tile // 8) * 8)    # sublane-aligned tile
    grid = (pl.cdiv(B, TB),)

    # --- parameters ----------------------------------------------------------
    # Weights stored/DMA'd in the MXU operand dtype (bf16 halves their stream).
    weights = [w.astype(mxu_dtype) for w, _ in params]
    # Pack all biases into one (L, max_d_out) f32 buffer: one spec, one DMA.
    b_packed = jnp.zeros((num_layers, max_d_out), jnp.float32)
    for l, (_, b) in enumerate(params):
        b_packed = b_packed.at[l, : b.shape[-1]].set(
            b.reshape(-1).astype(jnp.float32))

    # --- specs ---------------------------------------------------------------
    # x is the only per-step block.  If xprof ever shows exposed DMA on it,
    # add pipeline_mode=pl.Buffered(3) here (cheap: weights are constant-index).
    in_specs = [pl.BlockSpec((TB, D_in), lambda i: (i, 0))]
    inputs = [x]
    for (d_in, d_out), w in zip(layer_dims, weights):
        # Constant index_map -> DMA'd once, VMEM-resident across grid steps.
        in_specs.append(pl.BlockSpec((d_in, d_out), lambda i: (0, 0)))
        inputs.append(w)
    in_specs.append(pl.BlockSpec((num_layers, max_d_out), lambda i: (0, 0)))
    inputs.append(b_packed)

    out_specs = pl.BlockSpec((TB, D_out), lambda i: (i, 0))
    out_shape = jax.ShapeDtypeStruct((B, D_out), jnp.float32)

    # --- cost estimate (advisory) --------------------------------------------
    matmul_flops = 2 * B * sum(di * do for di, do in layer_dims)
    bytes_accessed = (
        x.size * x.dtype.itemsize
        + sum(int(w.size) * w.dtype.itemsize for w in weights)
        + int(b_packed.size) * 4
        + B * D_out * 4
    )
    cost = pl.CostEstimate(flops=matmul_flops, transcendentals=0,
                           bytes_accessed=bytes_accessed)

    kernel = functools.partial(_fused_mlp_kernel, mxu_dtype=mxu_dtype)
    return pl.pallas_call(
        kernel,
        out_shape=out_shape,
        grid=grid,
        in_specs=in_specs,
        out_specs=out_specs,
        compiler_params=pltpu.CompilerParams(
            dimension_semantics=("parallel",)),   # shards batch across v7x TCs
        cost_estimate=cost,
    )(*inputs)


# ---------------------------------------------------------------------------
# Deterministic parameter init matching Linear_QNet.__init__ layer shapes.
# ---------------------------------------------------------------------------
def init_linear_qnet_params(key, input_size, hidden_sizes, output_size):
    sizes = [input_size] + list(hidden_sizes) + [output_size]
    params = []
    for i in range(len(sizes) - 1):
        d_in, d_out = sizes[i], sizes[i + 1]
        key, wk, bk = jax.random.split(key, 3)
        bound = 1.0 / float(jnp.sqrt(jnp.float32(d_in)))
        w = jax.random.uniform(wk, (d_in, d_out), jnp.float32, -bound, bound)
        b = jax.random.uniform(bk, (1, d_out), jnp.float32, -bound, bound)
        params.append((w, b))
    return params


# TODO(synk): Linear_QNet.save / load (torch state_dict file I/O) have no Pallas
# equivalent; only the forward pass is implemented here.

if __name__ == "__main__":
    key = jax.random.PRNGKey(0)

    # Small shapes consistent with the module (a tiny Q-network).
    batch = 2
    input_size = 16
    hidden_sizes = (32, 64)
    output_size = 4

    pkey, xkey, x2key = jax.random.split(key, 3)
    params = init_linear_qnet_params(pkey, input_size, hidden_sizes, output_size)
    x = jax.random.normal(xkey, (batch, input_size), jnp.float32)

    # Pure-JAX references.
    def ref_fwd(params, x, op_dtype):
        h = x
        for w, b in params[:-1]:
            h = jnp.dot(h.astype(op_dtype), w.astype(op_dtype),
                        preferred_element_type=jnp.float32) + b
            h = jnp.maximum(h, 0.0)
        w, b = params[-1]
        return jnp.dot(h.astype(op_dtype), w.astype(op_dtype),
                       preferred_element_type=jnp.float32) + b

    ref_f32 = ref_fwd(params, x, jnp.float32)      # exact torch.nn.Linear semantics
    ref_bf16 = ref_fwd(params, x, jnp.bfloat16)    # same operand rounding as kernel

    # 1) Default path: bf16 MXU operands, f32 accumulate / epilogue.
    out = jax.block_until_ready(linear_qnet_forward(params, x))
    assert out.shape == (batch, output_size)
    assert jnp.allclose(out, ref_bf16, atol=2e-3, rtol=1e-2)
    assert jnp.allclose(out, ref_f32, atol=5e-2, rtol=5e-2)

    # 2) fp32-operand path: exact parity with the PyTorch module.
    out_f32 = jax.block_until_ready(
        linear_qnet_forward(params, x, mxu_dtype=jnp.float32))
    assert jnp.allclose(out_f32, ref_f32, atol=1e-5, rtol=1e-5)

    # 3) Tiled path: grid > 1 with a ragged last block (no wrapper pad/slice).
    B2 = 300
    x2 = jax.random.normal(x2key, (B2, input_size), jnp.float32)
    out2 = jax.block_until_ready(
        linear_qnet_forward(params, x2, batch_tile=128))
    assert out2.shape == (B2, output_size)
    assert jnp.allclose(out2, ref_fwd(params, x2, jnp.bfloat16),
                        atol=2e-3, rtol=1e-2)

    print("KERNEL_OK")
</pallas_src>

<mosaic_0001>
module attributes {stable_mosaic.version = 11 : i64} {
  func.func @_fused_mlp_kernel(%arg0: i32, %arg1: memref<2x16xf32, #tpu.memory_space<vmem>>, %arg2: memref<16x32xbf16, #tpu.memory_space<vmem>>, %arg3: memref<32x64xbf16, #tpu.memory_space<vmem>>, %arg4: memref<64x4xbf16, #tpu.memory_space<vmem>>, %arg5: memref<3x64xf32, #tpu.memory_space<vmem>>, %arg6: memref<2x4xf32, #tpu.memory_space<vmem>>) attributes {dimension_semantics = [#tpu.dimension_semantics<parallel>], iteration_bounds = array<i64: 1>, scalar_prefetch = 0 : i64, scratch_operands = 0 : i64, tpu.core_type = #tpu.core_type<tc>, window_params = [{transform_indices = @transform_0, window_bounds = array<i64: 2, 16>}, {pipeline_mode = #tpu.pipeline_mode<synchronous>, transform_indices = @transform_1, window_bounds = array<i64: 16, 32>}, {pipeline_mode = #tpu.pipeline_mode<synchronous>, transform_indices = @transform_2, window_bounds = array<i64: 32, 64>}, {pipeline_mode = #tpu.pipeline_mode<synchronous>, transform_indices = @transform_3, window_bounds = array<i64: 64, 4>}, {pipeline_mode = #tpu.pipeline_mode<synchronous>, transform_indices = @transform_4, window_bounds = array<i64: 3, 64>}, {transform_indices = @transform_5, window_bounds = array<i64: 2, 4>}]} {
    %c0 = arith.constant 0 : index
    %c0_0 = arith.constant 0 : index
    %0 = vector.load %arg5[%c0, %c0_0] : memref<3x64xf32, #tpu.memory_space<vmem>>, vector<3x64xf32>
    %c0_1 = arith.constant 0 : index
    %c0_2 = arith.constant 0 : index
    %1 = vector.load %arg1[%c0_1, %c0_2] : memref<2x16xf32, #tpu.memory_space<vmem>>, vector<2x16xf32>
    %c0_3 = arith.constant 0 : index
    %c0_4 = arith.constant 0 : index
    %2 = vector.load %arg2[%c0_3, %c0_4] : memref<16x32xbf16, #tpu.memory_space<vmem>>, vector<16x32xbf16>
    %3 = arith.truncf %1 : vector<2x16xf32> to vector<2x16xbf16>
    %cst = arith.constant dense<0.000000e+00> : vector<2x32xf32>
    %4 = tpu.matmul %3, %2, %cst {dimension_numbers = #tpu.dot_dimension_numbers<[1], [0], [0], [1], [0, 0, 1, 1], [], []>} : vector<2x16xbf16>, vector<16x32xbf16>, vector<2x32xf32> -> vector<2x32xf32>
    %5 = vector.extract_strided_slice %0 {offsets = [0, 0], sizes = [1, 32], strides = [1, 1]} : vector<3x64xf32> to vector<1x32xf32>
    %6 = vector.shape_cast %5 : vector<1x32xf32> to vector<32xf32>
    %7 = vector.shape_cast %6 : vector<32xf32> to vector<1x32xf32>
    %8 = vector.broadcast %7 : vector<1x32xf32> to vector<2x32xf32>
    %9 = arith.addf %4, %8 : vector<2x32xf32>
    %cst_5 = arith.constant 0.000000e+00 : f32
    %10 = vector.broadcast %cst_5 : f32 to vector<2x32xf32>
    %11 = arith.maximumf %9, %10 : vector<2x32xf32>
    %c0_6 = arith.constant 0 : index
    %c0_7 = arith.constant 0 : index
    %12 = vector.load %arg3[%c0_6, %c0_7] : memref<32x64xbf16, #tpu.memory_space<vmem>>, vector<32x64xbf16>
    %13 = arith.truncf %11 : vector<2x32xf32> to vector<2x32xbf16>
    %cst_8 = arith.constant dense<0.000000e+00> : vector<2x64xf32>
    %14 = tpu.matmul %13, %12, %cst_8 {dimension_numbers = #tpu.dot_dimension_numbers<[1], [0], [0], [1], [0, 0, 1, 1], [], []>} : vector<2x32xbf16>, vector<32x64xbf16>, vector<2x64xf32> -> vector<2x64xf32>
    %15 = vector.extract_strided_slice %0 {offsets = [1, 0], sizes = [1, 64], strides = [1, 1]} : vector<3x64xf32> to vector<1x64xf32>
    %16 = vector.shape_cast %15 : vector<1x64xf32> to vector<64xf32>
    %17 = vector.shape_cast %16 : vector<64xf32> to vector<1x64xf32>
    %18 = vector.broadcast %17 : vector<1x64xf32> to vector<2x64xf32>
    %19 = arith.addf %14, %18 : vector<2x64xf32>
    %cst_9 = arith.constant 0.000000e+00 : f32
    %20 = vector.broadcast %cst_9 : f32 to vector<2x64xf32>
    %21 = arith.maximumf %19, %20 : vector<2x64xf32>
    %c0_10 = arith.constant 0 : index
    %c0_11 = arith.constant 0 : index
    %22 = vector.load %arg4[%c0_10, %c0_11] : memref<64x4xbf16, #tpu.memory_space<vmem>>, vector<64x4xbf16>
    %23 = arith.truncf %21 : vector<2x64xf32> to vector<2x64xbf16>
    %cst_12 = arith.constant dense<0.000000e+00> : vector<2x4xf32>
    %24 = tpu.matmul %23, %22, %cst_12 {dimension_numbers = #tpu.dot_dimension_numbers<[1], [0], [0], [1], [0, 0, 1, 1], [], []>} : vector<2x64xbf16>, vector<64x4xbf16>, vector<2x4xf32> -> vector<2x4xf32>
    %25 = vector.extract_strided_slice %0 {offsets = [2, 0], sizes = [1, 4], strides = [1, 1]} : vector<3x64xf32> to vector<1x4xf32>
    %26 = vector.shape_cast %25 : vector<1x4xf32> to vector<4xf32>
    %27 = vector.shape_cast %26 : vector<4xf32> to vector<1x4xf32>
    %28 = vector.broadcast %27 : vector<1x4xf32> to vector<2x4xf32>
    %29 = arith.addf %24, %28 : vector<2x4xf32>
    %c0_13 = arith.constant 0 : index
    %c0_14 = arith.constant 0 : index
    %30 = vector.load %arg6[%c0_13, %c0_14] : memref<2x4xf32, #tpu.memory_space<vmem>>, vector<2x4xf32>
    tpu.vector_store %arg6[%c0_13, %c0_14], %29 {strides = array<i32>} : memref<2x4xf32, #tpu.memory_space<vmem>>, vector<2x4xf32>,
    return
  }
  func.func @transform_0(%arg0: i32) -> (i32, i32) {
    %c0_i32 = arith.constant 0 : i32
    %c0_i32_0 = arith.constant 0 : i32
    return %arg0, %c0_i32 : i32, i32
  }
  func.func @transform_1(%arg0: i32) -> (i32, i32) {
    %c0_i32 = arith.constant 0 : i32
    %c0_i32_0 = arith.constant 0 : i32
    %c0_i32_1 = arith.constant 0 : i32
    return %c0_i32, %c0_i32_0 : i32, i32
  }
  func.func @transform_2(%arg0: i32) -> (i32, i32) {
    %c0_i32 = arith.constant 0 : i32
    %c0_i32_0 = arith.constant 0 : i32
    %c0_i32_1 = arith.constant 0 : i32
    return %c0_i32, %c0_i32_0 : i32, i32
  }
  func.func @transform_3(%arg0: i32) -> (i32, i32) {
    %c0_i32 = arith.constant 0 : i32
    %c0_i32_0 = arith.constant 0 : i32
    %c0_i32_1 = arith.constant 0 : i32
    return %c0_i32, %c0_i32_0 : i32, i32
  }
  func.func @transform_4(%arg0: i32) -> (i32, i32) {
    %c0_i32 = arith.constant 0 : i32
    %c0_i32_0 = arith.constant 0 : i32
    %c0_i32_1 = arith.constant 0 : i32
    return %c0_i32, %c0_i32_0 : i32, i32
  }
  func.func @transform_5(%arg0: i32) -> (i32, i32) {
    %c0_i32 = arith.constant 0 : i32
    %c0_i32_0 = arith.constant 0 : i32
    return %arg0, %c0_i32 : i32, i32
  }
}

</mosaic_0001>

<bundles_post_ra>
// kernel: tpu_custom_call.1
= control target key start
LH: loop header
LB: loop body
LE: loop exit
PB: predicated region body
PF: predicated region fallthrough
CT: control target
= control target key end

     0   :  { %v325_v1 = vmov 0.0   ;;  %vm326_vm0 = vmmov 0   ;;  %vm37_vm1 = vcmask 130048   ;;  %s397_s0 = inlined_call_operand.vmem [shape: f32[2,16], index: 0, kind: input, shape index: {}]   ;;  %s398_s1 = inlined_call_operand.vmem [shape: bf16[16,32], index: 1, kind: input, shape index: {}]   ;;  %s399_s2 = inlined_call_operand.vmem [shape: bf16[32,64], index: 2, kind: input, shape index: {}]   ;;  %s400_s3 = inlined_call_operand.vmem [shape: bf16[64,4], index: 3, kind: input, shape index: {}]   ;;  %s401_s4 = inlined_call_operand.vmem [shape: f32[3,64], index: 4, kind: input, shape index: {}]   ;;  %s402_s5 = inlined_call_operand.hbm [shape: f32[2,4], index: 5, kind: output, shape index: {}]  }
   0x1   :  { %v294_v0 = vld [vmem:[%s398_s1] sm:$0xff]   ;;  %265 = vmatprep.subr.bf16.mxu1 %v325_v1  ;;  %279 = vmatprep.subr.bf16.mxu0 %v325_v1 }
   0x2   :  { %v23_v2 = vld [vmem:[%s397_s0] sm:$0x3]  ;;  %266 = vmatpush3.bf16.msra.mxu1 %v294_v0  ;;  %267 = vmatprep.mubr.msk.bf16.mxu1 %vm326_vm0, %v325_v1 }
   0x3   :  { %v26_v3 = vpack.c.bf16 %v23_v2, %v23_v2  ;;  %v295_v4 = vld [vmem:[%s399_s2] sm:$0xff]   ;;  %271 = vmatprep.subr.bf16.mxu1 %v325_v1  ;;  %287 = vmatprep.mubr.msk.bf16.mxu0 %vm326_vm0, %v325_v1 }
   0x5   :  { %268 = vmatmul.mubr.msk.bf16.vlgmr.msra.gmra.mrb[0].mxu1 %vm37_vm1, %v26_v3 }
   0x6   :  { %272 = vmatpush3.bf16.msra.mxu1 %v295_v4  ;;  %275 = vmatprep.mubr.msk.bf16.mxu1 %vm326_vm0, %v325_v1 }
   0x7   :  { %10 = vsyncpa [#allocation3], 0  ;;  %273 = vmatprep.subr.bf16.mxu1 %v325_v1  ;;  %v296_v5 = vld [vmem:[%s399_s2 + $0x8] sm:$0xff]   ;;  %v297_v6 = vld [vmem:[%s400_s3] sm:$0xff]   ;;  %v27_v8 = vlaneseq  ;;  %vm103_vm2 = vcmask 261120   ;;  %vm185_vm3 = vcmask 523264  }
   0x8   :  { %280 = vmatpush3.bf16.msra.mxu0 %v297_v6  ;;  %v298_v7 = vld [vmem:[%s400_s3 + $0x8] sm:$0xff]   ;;  %v22_v11 = vld [vmem:[%s401_s4] sm:$0x7]  ;;  %v299_v20 = vld [vmem:[%s400_s3 + $0x10] sm:$0xff]   ;;  %s327_s4 = smov [#allocation2]   ;;  %vm229_vm4 = vcmask 25600  }
   0x9   :  { %281 = vmatprep.subr.bf16.mxu0 %v325_v1  ;;  %v28_v9 = vshrl.u32 %v27_v8, 7  ;;  %v300_v21 = vld [vmem:[%s400_s3 + $0x18] sm:$0xff]   ;;  %s237_s8 = sshll.u32 %s327_s4, 4  ;;  %s238_s8 = int_to_ptr.vmem [resolvable:$true] %s237_s8 }
   0xa   :  { %274 = vmatpush3.bf16.msra.mxu1 %v296_v5  ;;  %s301_s3 = scalar_lea.vmem %s238_s8, 32  ;;  %p306_p1 = scmp.lt.s32.totalorder %s238_s8, %s238_s8 }
   0xb   :  { %v29_v10 = vsub.s32 0, %v28_v9  ;;  %v89_v22 = vsub.s32 1, %v28_v9  ;;  %v159_v31 = vsub.s32 2, %v28_v9  ;;  %p302_p0 = scmp.ne.s32.totalorder %s238_s8, %s301_s3  ;;  %p307_p2 = scmp.lt.s32.totalorder %s301_s3, %s301_s3 }
   0xc   :  { %282 = vmatpush3.bf16.msra.mxu0 %v298_v7 }
   0xd   :  { %283 = vmatprep.subr.bf16.mxu0 %v325_v1  ;;  %v30_v12 = vrot.slane %v22_v11, %v29_v10  ;;  %v90_v23 = vrot.slane %v22_v11, %v89_v22  ;;  %v160_v32 = vrot.slane %v22_v11, %v159_v31  ;;  %p308_p3 = por %p307_p2, %p306_p1 }
   0xf   :  { %p309_p4 = pnand %p308_p3, %p302_p0 }
  0x10   :  { %284 = vmatpush3.bf16.msra.mxu0 %v299_v20 }
  0x11   :  { %285 = vmatprep.subr.bf16.mxu0 %v325_v1 }
  0x14   :  { %286 = vmatpush3.bf16.msra.mxu0 %v300_v21 }
  0xd8   :  { %v75_v13 = vpop.f32.mrb[0].mxu1 }
  0xd9   :  { %v76_v14 = vadd.f32 %v75_v13, %v30_v12  ;;  %v269_v15 = vpop.f32.mrb[1].mxu1 }
  0xda   :  { %v78_v16 = vpop.f32.mrb[2].mxu1 }
  0xdb   :  { %v81_v17 = vmax.f32 %v76_v14, 0.0  ;;  %v270_v18 = vpop.f32.mrb[3].mxu1 }
  0xdd   :  { %v86_v19 = vpack.c.bf16 %v81_v17, %v81_v17 }
  0xdf   :  { %276 = vmatmul.mubr.msk.bf16.vlgmr.msra.gmra.mrb[4].mxu1 %vm103_vm2, %v86_v19 }
 0x1b2   :  { %v141_v24 = vpop.f32.mrb[4].mxu1 }
 0x1b3   :  { %v142_v25 = vadd.f32 %v141_v24, %v90_v23  ;;  %v277_v26 = vpop.f32.mrb[5].mxu1 }
 0x1b4   :  { %v144_v27 = vpop.f32.mrb[6].mxu1 }
 0x1b5   :  { %v147_v28 = vmax.f32 %v142_v25, 0.0  ;;  %v278_v29 = vpop.f32.mrb[7].mxu1 }
 0x1b7   :  { %v156_v30 = vpack.c.bf16 %v147_v28, %v147_v28 }
 0x1b9   :  { %288 = vmatmul.mubr.msk.bf16.vlgmr.msra.gmra.mrb[0].mxu0 %vm185_vm3, %v156_v30 }
 0x28c   :  { %v223_v33 = vpop.f32.mrb[0].mxu0 }
 0x28d   :  { %v224_v34 = vadd.f32 %v223_v33, %v160_v32  ;;  %v289_v35 = vpop.f32.mrb[1].mxu0 }
 0x28e   :  { %v226_v36 = vpop.f32.mrb[2].mxu0 }
 0x28f   :  { %v290_v37 = vpop.f32.mrb[3].mxu0  ;;  %230 = vst.msk [vmem:[#allocation2] sm:$0x3] %vm229_vm4, %v224_v34 }
 0x290   :  { %312 = shalt.err (!%p309_p4)
}
 0x291   :  { %s313_s11 = scalar_lea.hbm %s402_s5, 32 }
 0x292   :  { %p314_p5 = scmp.ne.s32.totalorder %s402_s5, %s313_s11  ;;  %p317_p6 = scmp.lt.u32.totalorder %s313_s11, %s402_s5 }
 0x294   :  { %p319_p7 = pnand %p317_p6, %p314_p5 }
 0x296   :  { %322 = shalt.err (!%p319_p7)
}
 0x297   :  { %240 = dma.vmem_to_hbm [thread:$0]  %s238_s8, 32, %s402_s5, [#allocation3]  }
 0x298   :  { %323 = dma.done.wait [#allocation3], 32  }
 0x299   :  { %324 = vsyncadd [#allocation3], 4294967264 }
 0x29a   :  { %244 = vsyncpa [#allocation3], 1 }

</bundles_post_ra>
